<compile_context>
chip_gen: v7x
topology: tpu7x:2x2x1
jax: 0.10.0
libtpu: 0.0.40
codegen_flags: <defaults>
</compile_context>

<pallas_src>
import functools

import jax
import jax.numpy as jnp
from jax.experimental import pallas as pl
from jax.experimental.pallas import tpu as pltpu


# --------------------------------------------------------------------------- #
# Kernel
# --------------------------------------------------------------------------- #
def _vg_loss_kernel(boxes_ref, l1_ref, giou_ref, *, inv_num_pos, box_xyxy):
    """boxes_ref: (8, N) f32 — rows 0:4 = src boxes, rows 4:8 = target boxes.

    Writes per-layer reduced losses into (1, 1) VMEM outputs.
    """
    b = boxes_ref[...]                       # (8, N)
    src = b[0:4, :]                          # (4, N) cxcywh (or xyxy)
    tgt = b[4:8, :]                          # (4, N)

    # ---- L1 regression loss on the raw box parametrization -------------- #
    l1_ref[...] = (
        jnp.sum(jnp.abs(src - tgt), axis=(0, 1), keepdims=True) * inv_num_pos
    )

    # ---- GIoU loss ------------------------------------------------------- #
    # Corner representation, computed on (2, N) halves (pairwise vector math).
    if box_xyxy:
        s_lt, s_rb = src[0:2, :], src[2:4, :]
        t_lt, t_rb = tgt[0:2, :], tgt[2:4, :]
    else:
        s_lt = src[0:2, :] - 0.5 * src[2:4, :]
        s_rb = src[0:2, :] + 0.5 * src[2:4, :]
        t_lt = tgt[0:2, :] - 0.5 * tgt[2:4, :]
        t_rb = tgt[0:2, :] + 0.5 * tgt[2:4, :]

    s_wh = s_rb - s_lt                       # (2, N)
    t_wh = t_rb - t_lt
    area_s = s_wh[0:1, :] * s_wh[1:2, :]     # (1, N)
    area_t = t_wh[0:1, :] * t_wh[1:2, :]

    inter_wh = jnp.maximum(
        jnp.minimum(s_rb, t_rb) - jnp.maximum(s_lt, t_lt), 0.0)
    inter = inter_wh[0:1, :] * inter_wh[1:2, :]
    union = area_s + area_t - inter
    iou = inter / union

    enc_wh = jnp.maximum(
        jnp.maximum(s_rb, t_rb) - jnp.minimum(s_lt, t_lt), 0.0)
    area_c = enc_wh[0:1, :] * enc_wh[1:2, :]
    giou = iou - (area_c - union) / area_c   # (1, N)

    giou_ref[...] = (
        jnp.sum(1.0 - giou, axis=(0, 1), keepdims=True) * inv_num_pos
    )


# --------------------------------------------------------------------------- #
# Wrapper (the VGCriterion.forward equivalent)
# --------------------------------------------------------------------------- #
def vg_criterion(pred_boxes, gt_boxes, aux_pred_boxes=(), *, box_xyxy=False,
                 world_size=1):
    """pred_boxes: (B, Q, 4); gt_boxes: (B, 4); aux_pred_boxes: list of (B, Q, 4).

    Returns a dict with keys 'l1', 'giou' and, for each aux output i,
    'l1_{i}', 'giou_{i}' — matching the PyTorch VGCriterion.
    """
    all_preds = [pred_boxes] + list(aux_pred_boxes)
    B, Q, _ = pred_boxes.shape
    L = len(all_preds)
    N = B * Q

    # Single-device num_pos (see TODO at top about the distributed all_reduce).
    num_pos = max(float(B * Q) / float(world_size), 1.0)

    # Pack GT (broadcast over queries) once, lane-dense: (4, N).
    tgt = jnp.broadcast_to(
        gt_boxes.astype(jnp.float32)[:, None, :], (B, Q, 4)
    ).reshape(N, 4).T

    # One (8, N) slab per layer: rows 0..3 src, rows 4..7 tgt.
    slabs = []
    for p in all_preds:
        src = p.astype(jnp.float32).reshape(N, 4).T        # (4, N)
        slabs.append(jnp.concatenate([src, tgt], axis=0))  # (8, N)
    packed = jnp.stack(slabs, axis=0)                      # (L, 8, N)

    kernel = functools.partial(
        _vg_loss_kernel, inv_num_pos=1.0 / num_pos, box_xyxy=box_xyxy)

    l1, giou = pl.pallas_call(
        kernel,
        out_shape=(jax.ShapeDtypeStruct((L, 1, 1), jnp.float32),
                   jax.ShapeDtypeStruct((L, 1, 1), jnp.float32)),
        grid=(L,),
        in_specs=[pl.BlockSpec((None, 8, N), lambda l: (l, 0, 0))],
        out_specs=(pl.BlockSpec((None, 1, 1), lambda l: (l, 0, 0)),
                   pl.BlockSpec((None, 1, 1), lambda l: (l, 0, 0))),
        compiler_params=pltpu.CompilerParams(
            dimension_semantics=("parallel",)),
    )(packed)

    losses = {'l1': l1[0, 0, 0], 'giou': giou[0, 0, 0]}
    for i in range(1, L):
        losses[f'l1_{i - 1}'] = l1[i, 0, 0]
        losses[f'giou_{i - 1}'] = giou[i, 0, 0]
    return losses


# --------------------------------------------------------------------------- #
# Pure-jnp reference (mirrors the PyTorch box_ops / VGCriterion math)
# --------------------------------------------------------------------------- #
def _box_cxcywh_to_xyxy(b):
    cx, cy, w, h = b[:, 0], b[:, 1], b[:, 2], b[:, 3]
    return jnp.stack([cx - 0.5 * w, cy - 0.5 * h,
                      cx + 0.5 * w, cy + 0.5 * h], axis=1)


def _box_pair_giou(b1, b2):
    area1 = (b1[:, 2] - b1[:, 0]) * (b1[:, 3] - b1[:, 1])
    area2 = (b2[:, 2] - b2[:, 0]) * (b2[:, 3] - b2[:, 1])
    lt = jnp.maximum(b1[:, :2], b2[:, :2])
    rb = jnp.minimum(b1[:, 2:], b2[:, 2:])
    wh = jnp.maximum(rb - lt, 0.0)
    inter = wh[:, 0] * wh[:, 1]
    union = area1 + area2 - inter
    iou = inter / union
    lt_c = jnp.minimum(b1[:, :2], b2[:, :2])
    rb_c = jnp.maximum(b1[:, 2:], b2[:, 2:])
    wh_c = jnp.maximum(rb_c - lt_c, 0.0)
    area_c = wh_c[:, 0] * wh_c[:, 1]
    return iou - (area_c - union) / area_c


def _vg_criterion_ref(pred_boxes, gt_boxes, aux_pred_boxes, box_xyxy, num_pos):
    def one(pred):
        B, Q, _ = pred.shape
        src = pred.reshape(-1, 4)
        tgt = jnp.broadcast_to(gt_boxes[:, None, :], (B, Q, 4)).reshape(-1, 4)
        l1 = jnp.sum(jnp.abs(src - tgt)) / num_pos
        if not box_xyxy:
            s, t = _box_cxcywh_to_xyxy(src), _box_cxcywh_to_xyxy(tgt)
        else:
            s, t = src, tgt
        g = jnp.sum(1.0 - _box_pair_giou(s, t)) / num_pos
        return l1, g

    losses = {}
    l1, g = one(pred_boxes)
    losses['l1'], losses['giou'] = l1, g
    for i, aux in enumerate(aux_pred_boxes):
        l1, g = one(aux)
        losses[f'l1_{i}'], losses[f'giou_{i}'] = l1, g
    return losses


# --------------------------------------------------------------------------- #
# Demo / self-check
# --------------------------------------------------------------------------- #
if __name__ == "__main__":
    key = jax.random.PRNGKey(0)
    kc, ks, kgc, kgs, ka = jax.random.split(key, 5)

    B, Q, n_aux = 2, 8, 2

    def make_boxes(kcen, ksz, shape):
        centers = jax.random.uniform(kcen, shape + (2,), jnp.float32, 0.3, 0.7)
        sizes = jax.random.uniform(ksz, shape + (2,), jnp.float32, 0.1, 0.3)
        return jnp.concatenate([centers, sizes], axis=-1)

    pred_boxes = make_boxes(kc, ks, (B, Q))          # (B, Q, 4) cxcywh
    gt_boxes = make_boxes(kgc, kgs, (B,))            # (B, 4)    cxcywh
    aux_keys = jax.random.split(ka, 2 * n_aux)
    aux_pred_boxes = [
        make_boxes(aux_keys[2 * i], aux_keys[2 * i + 1], (B, Q))
        for i in range(n_aux)
    ]

    losses = vg_criterion(pred_boxes, gt_boxes, aux_pred_boxes, box_xyxy=False)
    losses = jax.block_until_ready(losses)

    num_pos = max(float(B * Q), 1.0)
    ref = _vg_criterion_ref(pred_boxes, gt_boxes, aux_pred_boxes, False, num_pos)

    for name in ref:
        assert jnp.allclose(losses[name], ref[name], atol=1e-5, rtol=1e-5), (
            name, losses[name], ref[name])
    print("KERNEL_OK")
</pallas_src>

<mosaic_0001>
module attributes {stable_mosaic.version = 11 : i64} {
  func.func @_vg_loss_kernel(%arg0: i32, %arg1: memref<1x8x16xf32, #tpu.memory_space<vmem>>, %arg2: memref<1x1x1xf32, #tpu.memory_space<vmem>>, %arg3: memref<1x1x1xf32, #tpu.memory_space<vmem>>) attributes {dimension_semantics = [#tpu.dimension_semantics<parallel>], iteration_bounds = array<i64: 3>, scalar_prefetch = 0 : i64, scratch_operands = 0 : i64, tpu.core_type = #tpu.core_type<tc>, window_params = [{transform_indices = @transform_0, window_bounds = array<i64: 1, 8, 16>}, {transform_indices = @transform_1, window_bounds = array<i64: 1, 1, 1>}, {transform_indices = @transform_2, window_bounds = array<i64: 1, 1, 1>}]} {
    %c0 = arith.constant 0 : index
    %c0_0 = arith.constant 0 : index
    %c0_1 = arith.constant 0 : index
    %0 = vector.load %arg1[%c0, %c0_0, %c0_1] : memref<1x8x16xf32, #tpu.memory_space<vmem>>, vector<1x8x16xf32>
    %1 = vector.shape_cast %0 : vector<1x8x16xf32> to vector<8x16xf32>
    %2 = vector.extract_strided_slice %1 {offsets = [0, 0], sizes = [4, 16], strides = [1, 1]} : vector<8x16xf32> to vector<4x16xf32>
    %3 = vector.extract_strided_slice %1 {offsets = [4, 0], sizes = [4, 16], strides = [1, 1]} : vector<8x16xf32> to vector<4x16xf32>
    %4 = arith.subf %2, %3 : vector<4x16xf32>
    %5 = math.absf %4 : vector<4x16xf32>
    %6 = vector.shape_cast %5 : vector<4x16xf32> to vector<1x4x16xf32>
    %cst = arith.constant dense<0.000000e+00> : vector<1xf32>
    %7 = vector.multi_reduction <add>, %6, %cst [1, 2] : vector<1x4x16xf32> to vector<1xf32>
    %8 = vector.shape_cast %7 : vector<1xf32> to vector<1x1x1xf32>
    %9 = vector.extract %8[0, 0, 0] : f32 from vector<1x1x1xf32>
    %10 = vector.broadcast %9 : f32 to vector<1x1xf32>
    %cst_2 = arith.constant 6.250000e-02 : f32
    %11 = vector.broadcast %cst_2 : f32 to vector<1x1xf32>
    %12 = arith.mulf %10, %11 : vector<1x1xf32>
    %c0_3 = arith.constant 0 : index
    %c0_4 = arith.constant 0 : index
    %c0_5 = arith.constant 0 : index
    %13 = vector.load %arg2[%c0_3, %c0_4, %c0_5] : memref<1x1x1xf32, #tpu.memory_space<vmem>>, vector<1x1x1xf32>
    %14 = vector.shape_cast %13 : vector<1x1x1xf32> to vector<1x1xf32>
    %15 = vector.shape_cast %12 : vector<1x1xf32> to vector<1x1x1xf32>
    tpu.vector_store %arg2[%c0_3, %c0_4, %c0_5], %15 {strides = array<i32>} : memref<1x1x1xf32, #tpu.memory_space<vmem>>, vector<1x1x1xf32>,
    %16 = vector.extract_strided_slice %2 {offsets = [0, 0], sizes = [2, 16], strides = [1, 1]} : vector<4x16xf32> to vector<2x16xf32>
    %17 = vector.extract_strided_slice %2 {offsets = [2, 0], sizes = [2, 16], strides = [1, 1]} : vector<4x16xf32> to vector<2x16xf32>
    %cst_6 = arith.constant 5.000000e-01 : f32
    %18 = vector.broadcast %cst_6 : f32 to vector<2x16xf32>
    %19 = arith.mulf %18, %17 : vector<2x16xf32>
    %20 = arith.subf %16, %19 : vector<2x16xf32>
    %21 = vector.extract_strided_slice %2 {offsets = [0, 0], sizes = [2, 16], strides = [1, 1]} : vector<4x16xf32> to vector<2x16xf32>
    %22 = vector.extract_strided_slice %2 {offsets = [2, 0], sizes = [2, 16], strides = [1, 1]} : vector<4x16xf32> to vector<2x16xf32>
    %cst_7 = arith.constant 5.000000e-01 : f32
    %23 = vector.broadcast %cst_7 : f32 to vector<2x16xf32>
    %24 = arith.mulf %23, %22 : vector<2x16xf32>
    %25 = arith.addf %21, %24 : vector<2x16xf32>
    %26 = vector.extract_strided_slice %3 {offsets = [0, 0], sizes = [2, 16], strides = [1, 1]} : vector<4x16xf32> to vector<2x16xf32>
    %27 = vector.extract_strided_slice %3 {offsets = [2, 0], sizes = [2, 16], strides = [1, 1]} : vector<4x16xf32> to vector<2x16xf32>
    %cst_8 = arith.constant 5.000000e-01 : f32
    %28 = vector.broadcast %cst_8 : f32 to vector<2x16xf32>
    %29 = arith.mulf %28, %27 : vector<2x16xf32>
    %30 = arith.subf %26, %29 : vector<2x16xf32>
    %31 = vector.extract_strided_slice %3 {offsets = [0, 0], sizes = [2, 16], strides = [1, 1]} : vector<4x16xf32> to vector<2x16xf32>
    %32 = vector.extract_strided_slice %3 {offsets = [2, 0], sizes = [2, 16], strides = [1, 1]} : vector<4x16xf32> to vector<2x16xf32>
    %cst_9 = arith.constant 5.000000e-01 : f32
    %33 = vector.broadcast %cst_9 : f32 to vector<2x16xf32>
    %34 = arith.mulf %33, %32 : vector<2x16xf32>
    %35 = arith.addf %31, %34 : vector<2x16xf32>
    %36 = arith.subf %25, %20 : vector<2x16xf32>
    %37 = arith.subf %35, %30 : vector<2x16xf32>
    %38 = vector.extract_strided_slice %36 {offsets = [0, 0], sizes = [1, 16], strides = [1, 1]} : vector<2x16xf32> to vector<1x16xf32>
    %39 = vector.extract_strided_slice %36 {offsets = [1, 0], sizes = [1, 16], strides = [1, 1]} : vector<2x16xf32> to vector<1x16xf32>
    %40 = arith.mulf %38, %39 : vector<1x16xf32>
    %41 = vector.extract_strided_slice %37 {offsets = [0, 0], sizes = [1, 16], strides = [1, 1]} : vector<2x16xf32> to vector<1x16xf32>
    %42 = vector.extract_strided_slice %37 {offsets = [1, 0], sizes = [1, 16], strides = [1, 1]} : vector<2x16xf32> to vector<1x16xf32>
    %43 = arith.mulf %41, %42 : vector<1x16xf32>
    %44 = arith.minimumf %25, %35 : vector<2x16xf32>
    %45 = arith.maximumf %20, %30 : vector<2x16xf32>
    %46 = arith.subf %44, %45 : vector<2x16xf32>
    %cst_10 = arith.constant 0.000000e+00 : f32
    %47 = vector.broadcast %cst_10 : f32 to vector<2x16xf32>
    %48 = arith.maximumf %46, %47 : vector<2x16xf32>
    %49 = vector.extract_strided_slice %48 {offsets = [0, 0], sizes = [1, 16], strides = [1, 1]} : vector<2x16xf32> to vector<1x16xf32>
    %50 = vector.extract_strided_slice %48 {offsets = [1, 0], sizes = [1, 16], strides = [1, 1]} : vector<2x16xf32> to vector<1x16xf32>
    %51 = arith.mulf %49, %50 : vector<1x16xf32>
    %52 = arith.addf %40, %43 : vector<1x16xf32>
    %53 = arith.subf %52, %51 : vector<1x16xf32>
    %54 = arith.divf %51, %53 : vector<1x16xf32>
    %55 = arith.maximumf %25, %35 : vector<2x16xf32>
    %56 = arith.minimumf %20, %30 : vector<2x16xf32>
    %57 = arith.subf %55, %56 : vector<2x16xf32>
    %cst_11 = arith.constant 0.000000e+00 : f32
    %58 = vector.broadcast %cst_11 : f32 to vector<2x16xf32>
    %59 = arith.maximumf %57, %58 : vector<2x16xf32>
    %60 = vector.extract_strided_slice %59 {offsets = [0, 0], sizes = [1, 16], strides = [1, 1]} : vector<2x16xf32> to vector<1x16xf32>
    %61 = vector.extract_strided_slice %59 {offsets = [1, 0], sizes = [1, 16], strides = [1, 1]} : vector<2x16xf32> to vector<1x16xf32>
    %62 = arith.mulf %60, %61 : vector<1x16xf32>
    %63 = arith.subf %62, %53 : vector<1x16xf32>
    %64 = arith.divf %63, %62 : vector<1x16xf32>
    %65 = arith.subf %54, %64 : vector<1x16xf32>
    %cst_12 = arith.constant 1.000000e+00 : f32
    %66 = vector.broadcast %cst_12 : f32 to vector<1x16xf32>
    %67 = arith.subf %66, %65 : vector<1x16xf32>
    %68 = vector.shape_cast %67 : vector<1x16xf32> to vector<1x1x16xf32>
    %cst_13 = arith.constant dense<0.000000e+00> : vector<1xf32>
    %69 = vector.multi_reduction <add>, %68, %cst_13 [1, 2] : vector<1x1x16xf32> to vector<1xf32>
    %70 = vector.shape_cast %69 : vector<1xf32> to vector<1x1x1xf32>
    %71 = vector.extract %70[0, 0, 0] : f32 from vector<1x1x1xf32>
    %72 = vector.broadcast %71 : f32 to vector<1x1xf32>
    %cst_14 = arith.constant 6.250000e-02 : f32
    %73 = vector.broadcast %cst_14 : f32 to vector<1x1xf32>
    %74 = arith.mulf %72, %73 : vector<1x1xf32>
    %c0_15 = arith.constant 0 : index
    %c0_16 = arith.constant 0 : index
    %c0_17 = arith.constant 0 : index
    %75 = vector.load %arg3[%c0_15, %c0_16, %c0_17] : memref<1x1x1xf32, #tpu.memory_space<vmem>>, vector<1x1x1xf32>
    %76 = vector.shape_cast %75 : vector<1x1x1xf32> to vector<1x1xf32>
    %77 = vector.shape_cast %74 : vector<1x1xf32> to vector<1x1x1xf32>
    tpu.vector_store %arg3[%c0_15, %c0_16, %c0_17], %77 {strides = array<i32>} : memref<1x1x1xf32, #tpu.memory_space<vmem>>, vector<1x1x1xf32>,
    return
  }
  func.func @transform_0(%arg0: i32) -> (i32, i32, i32) {
    %c0_i32 = arith.constant 0 : i32
    %c0_i32_0 = arith.constant 0 : i32
    %c0_i32_1 = arith.constant 0 : i32
    return %arg0, %c0_i32, %c0_i32_0 : i32, i32, i32
  }
  func.func @transform_1(%arg0: i32) -> (i32, i32, i32) {
    %c0_i32 = arith.constant 0 : i32
    %c0_i32_0 = arith.constant 0 : i32
    %c0_i32_1 = arith.constant 0 : i32
    return %arg0, %c0_i32, %c0_i32_0 : i32, i32, i32
  }
  func.func @transform_2(%arg0: i32) -> (i32, i32, i32) {
    %c0_i32 = arith.constant 0 : i32
    %c0_i32_0 = arith.constant 0 : i32
    %c0_i32_1 = arith.constant 0 : i32
    return %arg0, %c0_i32, %c0_i32_0 : i32, i32, i32
  }
}

</mosaic_0001>

<bundles_post_ra>
// kernel: tpu_custom_call.1
= control target key start
LH: loop header
LB: loop body
LE: loop exit
PB: predicated region body
PF: predicated region fallthrough
CT: control target
= control target key end

     0   :  { %8 = vsyncpa [#allocation3], 0  ;;  %s578_s0 = inlined_call_operand.hbm [shape: f32[3,8,16], index: 0, kind: input, shape index: {}]   ;;  %s579_s1 = inlined_call_operand.vmem [shape: f32[3,1,1], index: 1, kind: output, shape index: {0}]   ;;  %s580_s2 = inlined_call_operand.vmem [shape: f32[3,1,1], index: 2, kind: output, shape index: {1}]  }
   0x1   :  { %10 = vsyncpa [#allocation3 + $0x1], 0  ;;  %s468_s9 = smov 0   ;;  %s470_s10 = smov 0  }
   0x2   :  { %s472_s11 = smov 0   ;;  %s474_s12 = smov 0  }
   0x3 LB: > { %s487_s13 = sadd.s32 4294967295, %s450_s12   ;;  %s490_s14 = sadd.s32 1, %s450_s12   ;;  %s450_s12 = sphi %s474_s12, %s588_s12   ;;  %s446_s11 = sphi %s472_s11, %s587_s11   ;;  %s442_s10 = sphi %s470_s10, %s586_s10   ;;  %s438_s9 = sphi %s468_s9, %s585_s9  }
   0x4   : > { %s20_s15 = ssub.s32 %s450_s12, %s490_s14  ;;  %s23_s16 = sadd.s32 1, %s446_s11 }
   0x5   : > { %p21_p0 = scmp.eq.s32.totalorder %s20_s15, 0  ;;  %p30_p1 = scmp.ne.s32.totalorder %s446_s11, %s442_s10 }
   0x6   : > { %p31_p2 = scmp.eq.s32.totalorder %s450_s12, 0  ;;  %p36_p3 = scmp.ne.s32.totalorder %s442_s10, %s438_s9 }
   0x7   : > { %s500_s17 = scalar_select %p21_p0, %s446_s11, %s23_s16  }
   0x8   : > { %p32_p4 = por %p31_p2, %p30_p1  ;;  %p37_p5 = scmp.eq.s32.totalorder %s487_s13, 0 }
   0x9   : > { %p349_p6 = scmp.lt.s32.totalorder %s450_s12, 3  ;;  %s112_s19 = sand.u32 1, %s446_s11  }
   0xa   : > { %p504_p7 = por %p37_p5, %p36_p3  ;;  %s333_s20 = sshll.u32 %s112_s19, 3 }
   0xb   : > { %s334_s21 = sshll.u32 %s450_s12, 7  ;;  %s116_s25 = scalar_lea.vmem [#allocation2], %s333_s20 }
   0xc   : > { %s513_s24 = scalar_lea.hbm %s578_s0, %s334_s21  ;;  %s123_s26 = sshll.u32 %s116_s25, 4  ;;  %s515_s26 = int_to_ptr.vmem [resolvable:$true] %s123_s26 }
   0xd   : > { %p517_p8 = pnand %p349_p6, %p32_p4  ;;  %s113_s28 = scalar_lea.sflag [#allocation3], %s112_s19 }
   0xe   : > { %s386_s29 = scalar_lea.hbm %s513_s24, 128  ;;  %s391_s4 = scalar_lea.hbm %s578_s0, 384 }
   0xf   : > { %p387_p11 = scmp.ne.s32.totalorder %s513_s24, %s386_s29  ;;  %p388_p12 = pneg %p517_p8 }
  0x10   : > { %p392_p1 = scmp.lt.u32.totalorder %s513_s24, %s578_s0  ;;  %p393_p2 = scmp.lt.u32.totalorder %s391_s4, %s386_s29 }
  0x11   : > { %p389_p13 = pnand %p388_p12, %p387_p11  ;;  %p395_p4 = scmp.lt.u32.totalorder %s386_s29, %s513_s24 }
  0x12   : > { %p394_p3 = por %p393_p2, %p392_p1 }
  0x13   : > { %p390_p0 = pneg %p389_p13 }
  0x14   : > { %p396_p5 = por %p395_p4, %p394_p3 }
  0x16   : > { %p397_p6 = pnand %p396_p5, %p390_p0 }
  0x18   : > { %400 = shalt.err (!%p397_p6)
}
  0x19   : > { %s401_s7 = scalar_lea.vmem %s515_s26, 128  ;;  %s452_s8 = smov [#allocation2]  }
  0x1a   : > { %p402_p11 = scmp.ne.s32.totalorder %s515_s26, %s401_s7  ;;  %s406_s9 = sshll.u32 %s452_s8, 4  ;;  %s407_s9 = int_to_ptr.vmem [resolvable:$false] %s406_s9 }
  0x1b   : > { %s408_s15 = scalar_lea.vmem %s407_s9, 256  ;;  %p409_p10 = scmp.lt.s32.totalorder %s515_s26, %s407_s9 }
  0x1c   : > { %p404_p13 = pnand %p402_p11, %p388_p12  ;;  %p410_p1 = scmp.lt.s32.totalorder %s408_s15, %s401_s7 }
  0x1e   : > { %p405_p9 = pneg %p404_p13  ;;  %p411_p2 = por %p410_p1, %p409_p10 }
  0x20   : > { %p412_p3 = pnand %p411_p2, %p405_p9 }
  0x22   : > { %415 = shalt.err (!%p412_p3)
}
  0x23   : > { %348 = dma.hbm_to_vmem [thread:$0]  (!%p517_p8), %s513_s24, 128, %s515_s26, %s113_s28  }
  0x24   : > { %p583_p0 = scmp.lt.s32.totalorder %s450_s12, 4  ;;  %p584_p4 = scmp.ge.s32.totalorder %s450_s12, 1 }
  0x26   : > { %p129_p12 = pnand %p584_p4, %p583_p0 }
  0x27   : > { %s134_s16 = sand.u32 (!%p129_p12), 1, %s442_s10  }
  0x28   : > { %132 = sbr.rel (%p129_p12) target bundleno = 295 (0x127), region = 24  ;;  %s336_s19 = sshll.u32 (!%p129_p12), %s134_s16, 3 }
  0x29   : > { %s135_s20 = scalar_lea.sflag (!%p129_p12), [#allocation3], %s134_s16  ;;  %s138_s21 = scalar_lea.vmem (!%p129_p12), [#allocation2], %s336_s19 }
  0x2f   : > { %433 = dma.done.wait (%p504_p7), %s135_s20, 128  }
  0x30   : > { %435 = vsyncadd (%p504_p7), %s135_s20, 4294967168  ;;  %v166_v0 = vld [vmem:[%s138_s21] sm:$0xff]  ;;  %vm172_vm0 = vcmask 125952   ;;  %vm232_vm1 = vcmask 122880   ;;  %p160_p7 = scmp.lt.s32.totalorder %s487_s13, 2  ;;  %vm185_vm2 = vcmask 0  }
  0x31   : > { %v168_v1 = vrot.slane %v166_v0, 4  ;;  %v187_v2 = vmul.f32 0.5, %v166_v0 }
  0x32   : > { %s590_s13 = smov (!%p160_p7, %s487_s13), 2 }
  0x33   : > { %v170_v3 = vsub.f32 %v166_v0, %v168_v1  ;;  %v189_v4 = vrot.slane %v187_v2, 2  ;;  %s162_s23 = scalar_lea.vmem %s579_s1, %s590_s13  ;;  %s165_s27 = scalar_lea.vmem %s580_s2, %s590_s13 }
  0x35   : > { %v171_v5 = vand.u32 2147483647, %v170_v3  ;;  %v191_v6 = vsub.f32 %v166_v0, %v189_v4  ;;  %v192_v7 = vadd.f32 %v189_v4, %v166_v0 }
  0x37   : > { %v173_v8 = vsel %vm172_vm0, %v171_v5, 0.0  ;;  %v193_v9 = vsub.f32 %v192_v7, %v191_v6  ;;  %v199_v10 = vrot.slane %v192_v7, 4  ;;  %v203_v11 = vrot.slane %v191_v6, 4 }
  0x38   : > { %174 = vadd.xlane.f32.xlu0 %v173_v8 }
  0x39   : > { %v195_v12 = vrot.slane %v193_v9, 1  ;;  %v201_v13 = vmin.f32 %v192_v7, %v199_v10  ;;  %v205_v14 = vmax.f32 %v191_v6, %v203_v11  ;;  %v219_v15 = vmax.f32 %v192_v7, %v199_v10 }
  0x3a   : > { %v220_v16 = vmin.f32 %v191_v6, %v203_v11 }
  0x3b   : > { %v197_v17 = vmul.f32 %v195_v12, %v193_v9  ;;  %v206_v18 = vsub.f32 %v201_v13, %v205_v14 }
  0x3c   : > { %v221_v19 = vsub.f32 %v219_v15, %v220_v16 }
  0x3d   : > { %v207_v20 = vmax.f32 %v206_v18, 0.0  ;;  %v213_v21 = vrot.slane %v197_v17, 4 }
  0x3e   : > { %v222_v22 = vmax.f32 %v221_v19, 0.0 }
  0x3f   : > { %v209_v23 = vrot.slane %v207_v20, 1  ;;  %v215_v24 = vadd.f32 %v213_v21, %v197_v17 }
  0x40   : > { %v224_v25 = vrot.slane %v222_v22, 1 }
  0x41   : > { %v211_v26 = vmul.f32 %v209_v23, %v207_v20 }
  0x42   : > { %v226_v27 = vmul.f32 %v224_v25, %v222_v22 }
  0x43   : > { %v216_v28 = vsub.f32 %v215_v24, %v211_v26 }
  0x44   : > { %382 = vrcp.f32 %v226_v27 }
  0x45   : > { %384 = vrcp.f32 %v216_v28  ;;  %v227_v29 = vsub.f32 %v226_v27, %v216_v28 }
  0x4e   : > { %v383_v30 = vpop.eup %382 }
  0x4f   : > { %v385_v31 = vpop.eup %384  ;;  %v229_v32 = vmul.f32 %v383_v30, %v227_v29 }
  0x50   : > { %v218_v33 = vmul.f32 %v385_v31, %v211_v26 }
  0x52   : > { %v230_v34 = vsub.f32 %v218_v33, %v229_v32 }
  0x54   : > { %v231_v35 = vsub.f32 1.0, %v230_v34 }
  0x56   : > { %v233_v36 = vsel %vm232_vm1, %v231_v35, 0.0 }
  0x57   : > { %234 = vadd.xlane.f32.xlu0 %v233_v36 }
  0xc5   : > { %v175_v37 = vpop.xlane.xlu0 %174 }
  0xc6   : > { %v176_v38 = vrot.slane %v175_v37, 4 }
  0xc8   : > { %v177_v39 = vadd.f32 %v176_v38, %v175_v37 }
  0xca   : > { %v178_v40 = vrot.slane %v177_v39, 2 }
  0xcc   : > { %v179_v41 = vadd.f32 %v178_v40, %v177_v39 }
  0xce   : > { %v180_v42 = vrot.slane %v179_v41, 1 }
  0xd0   : > { %v181_v43 = vadd.f32 %v180_v42, %v179_v41 }
  0xd2   : > { %339 = vpush %v181_v43 }
  0xe4   : > { %v235_v44 = vpop.xlane.xlu0 %234 }
  0xe5   : > { %v236_v45 = vrot.slane %v235_v44, 4 }
  0xe7   : > { %v237_v46 = vadd.f32 %v236_v45, %v235_v44 }
  0xe9   : > { %v238_v47 = vrot.slane %v237_v46, 2 }
  0xeb   : > { %v239_v48 = vadd.f32 %v238_v47, %v237_v46 }
  0xed   : > { %v240_v49 = vrot.slane %v239_v48, 1 }
  0xef   : > { %v241_v50 = vadd.f32 %v240_v49, %v239_v48 }
  0xf1   : > { %341 = vpush %v241_v50 }
 0x103   : > { %s340_s12 = spop %339 }
 0x104   : > { %v183_v51 = vstv %s340_s12 }
 0x105   : > { %v184_v52 = vmul.f32 0.0625, %v183_v51 }
 0x107   : > { %186 = vst.msk [vmem:[%s162_s23] sm:$0x1] %vm185_vm2, %v184_v52 }
 0x122   : > { %s342_s24 = spop %341 }
 0x123   : > { %v243_v53 = vstv %s342_s24 }
 0x124   : > { %v244_v54 = vmul.f32 0.0625, %v243_v53 }
 0x126   : > { %245 = vst.msk [vmem:[%s165_s27] sm:$0x1] %vm185_vm2, %v244_v54 }
 0x127 PF: > { %p13_p8 = scmp.ge.s32.totalorder %s490_s14, 5   ;;  %s585_s9 = smov %s442_s10 }
 0x128   : > { %s586_s10 = smov %s446_s11  ;;  %s587_s11 = smov %s500_s17 }
 0x129   : > { %s588_s12 = smov %s490_s14  ;;  %15 = sbr.rel (!%p13_p8) target bundleno = 3 (0x3), region = 76 }
 0x130   :  { %275 = vsyncpa [#allocation3], 1 }
 0x131   :  { %277 = vsyncpa [#allocation3 + $0x1], 1 }

</bundles_post_ra>
